<compile_context>
chip_gen: v7x
topology: tpu7x:2x2x1
jax: 0.10.0
libtpu: 0.0.40
codegen_flags: <defaults>
</compile_context>

<pallas_src>
import functools

import jax
import jax.numpy as jnp
from jax.experimental import pallas as pl
from jax.experimental.pallas import tpu as pltpu


# --------------------------------------------------------------------------- padding
def geo_cyclic_pad(x, pad):
    """Lat/lon ("geo-cyclic") padding of an NCHW tensor.

    Longitude (W) is padded circularly; latitude (H) is padded with rows
    reflected across the pole and rolled by half the longitude extent.
    """
    # TODO(synk): GeoCyclicPadding's source was not provided with the spec; this follows
    # the standard lat-lon convention (circular in W, pole-crossing + half-W roll in H).
    if pad == 0:
        return x
    _, _, H, W = x.shape
    top = jnp.roll(jnp.flip(x[:, :, :pad, :], axis=2), W // 2, axis=3)
    bot = jnp.roll(jnp.flip(x[:, :, H - pad:, :], axis=2), W // 2, axis=3)
    xh = jnp.concatenate([top, x, bot], axis=2)
    left = xh[:, :, :, W - pad:]
    right = xh[:, :, :, :pad]
    return jnp.concatenate([left, xh, right], axis=3)


# --------------------------------------------------------------------------- kernels
def _depthwise_kernel(x_ref, w_ref, o_ref, *, ksize):
    # x_ref: (Hp, Wp, TC) padded NHWC tile  (batch dim squeezed via block_shape None)
    # w_ref: (K*K, TC)    depthwise taps, channels on lanes
    # o_ref: (H, W, TC)
    H, W, _ = o_ref.shape
    acc = jnp.zeros(o_ref.shape, jnp.float32)
    for dh in range(ksize):            # static K*K unroll (K is small)
        for dw in range(ksize):
            win = x_ref[dh:dh + H, dw:dw + W, :].astype(jnp.float32)
            idx = dh * ksize + dw
            tap = w_ref[idx:idx + 1, :].astype(jnp.float32)   # (1, TC) -> lane bcast
            acc = acc + win * tap
    o_ref[...] = acc.astype(o_ref.dtype)


def _pointwise_kernel(x_ref, w_ref, b_ref, o_ref):
    # x_ref: (TM, C_in), w_ref: (C_in, C_out), b_ref: (1, C_out), o_ref: (TM, C_out)
    x = x_ref[...].astype(jnp.float32)
    w = w_ref[...].astype(jnp.float32)
    b = b_ref[...].astype(jnp.float32)
    y = jnp.dot(x, w, preferred_element_type=jnp.float32) + b
    o_ref[...] = y.astype(o_ref.dtype)


# --------------------------------------------------------------------------- wrapper
def sep_conv(x, dw_weight, pw_weight, pw_bias, *, kernel_size):
    """SepConv forward.

    x:         (N, C_in, H, W)
    dw_weight: (C_in, 1, K, K)    depthwise conv weight (groups=C_in, no bias)
    pw_weight: (C_out, C_in, 1, 1) CLinear (1x1 conv) weight
    pw_bias:   (C_out,)            CLinear bias
    returns    (N, C_out, H, W)
    """
    N, C_in, H, W = x.shape
    K = kernel_size
    C_out = pw_weight.shape[0]

    xpad = geo_cyclic_pad(x, K // 2) if K > 1 else x
    Hp, Wp = xpad.shape[2], xpad.shape[3]

    # NHWC for the depthwise stage: channels on lanes.
    x_nhwc = jnp.transpose(xpad, (0, 2, 3, 1))                       # (N, Hp, Wp, C_in)
    wd = jnp.transpose(dw_weight.reshape(C_in, K * K), (1, 0))       # (K*K, C_in)

    # Channel tiling: lane-dense 128 tiles when possible, else the full C_in.
    TC = 128 if (C_in % 128 == 0) else C_in
    c_tiles = C_in // TC

    y = pl.pallas_call(
        functools.partial(_depthwise_kernel, ksize=K),
        out_shape=jax.ShapeDtypeStruct((N, H, W, C_in), x.dtype),
        grid=(N, c_tiles),
        in_specs=[
            pl.BlockSpec((None, Hp, Wp, TC), lambda n, c: (n, 0, 0, c)),
            pl.BlockSpec((K * K, TC), lambda n, c: (0, c)),
        ],
        out_specs=pl.BlockSpec((None, H, W, TC), lambda n, c: (n, 0, 0, c)),
        compiler_params=pltpu.CompilerParams(
            dimension_semantics=("parallel", "parallel")),
    )(x_nhwc, wd)

    # Pointwise CLinear: (N*H*W, C_in) @ (C_in, C_out) + bias, row-tiled.
    M = N * H * W
    TM = 256
    M_pad = -(-M // TM) * TM
    y2 = y.reshape(M, C_in)
    if M_pad != M:
        y2 = jnp.pad(y2, ((0, M_pad - M), (0, 0)))
    w2 = jnp.transpose(pw_weight.reshape(C_out, C_in), (1, 0))       # (C_in, C_out)
    b2 = pw_bias.reshape(1, C_out)

    out2 = pl.pallas_call(
        _pointwise_kernel,
        out_shape=jax.ShapeDtypeStruct((M_pad, C_out), x.dtype),
        grid=(M_pad // TM,),
        in_specs=[
            pl.BlockSpec((TM, C_in), lambda i: (i, 0)),
            pl.BlockSpec((C_in, C_out), lambda i: (0, 0)),
            pl.BlockSpec((1, C_out), lambda i: (0, 0)),
        ],
        out_specs=pl.BlockSpec((TM, C_out), lambda i: (i, 0)),
        compiler_params=pltpu.CompilerParams(
            dimension_semantics=("parallel",)),
    )(y2, w2, b2)

    out = out2[:M].reshape(N, H, W, C_out)
    return jnp.transpose(out, (0, 3, 1, 2))                          # (N, C_out, H, W)


# --------------------------------------------------------------------------- reference
def sep_conv_ref(x, dw_weight, pw_weight, pw_bias, *, kernel_size):
    """Pure-JAX reference mirroring the PyTorch SepConv forward."""
    N, C_in, H, W = x.shape
    xf = x.astype(jnp.float32)
    if kernel_size > 1:
        xf = geo_cyclic_pad(xf, kernel_size // 2)
    y = jax.lax.conv_general_dilated(
        xf, dw_weight.astype(jnp.float32),
        window_strides=(1, 1), padding="VALID",
        dimension_numbers=("NCHW", "OIHW", "NCHW"),
        feature_group_count=C_in)
    out = jax.lax.conv_general_dilated(
        y, pw_weight.astype(jnp.float32),
        window_strides=(1, 1), padding="VALID",
        dimension_numbers=("NCHW", "OIHW", "NCHW"))
    out = out + pw_bias.astype(jnp.float32)[None, :, None, None]
    return out.astype(x.dtype)


if __name__ == "__main__":
    key = jax.random.PRNGKey(0)
    N, C_in, C_out, H, W, K = 2, 4, 8, 16, 16, 3
    k1, k2, k3, k4 = jax.random.split(key, 4)
    x = jax.random.normal(k1, (N, C_in, H, W), dtype=jnp.float32)
    dw_weight = 0.2 * jax.random.normal(k2, (C_in, 1, K, K), dtype=jnp.float32)
    pw_weight = 0.2 * jax.random.normal(k3, (C_out, C_in, 1, 1), dtype=jnp.float32)
    pw_bias = 0.1 * jax.random.normal(k4, (C_out,), dtype=jnp.float32)

    out = sep_conv(x, dw_weight, pw_weight, pw_bias, kernel_size=K)
    out = jax.block_until_ready(out)

    ref = sep_conv_ref(x, dw_weight, pw_weight, pw_bias, kernel_size=K)
    assert out.shape == (N, C_out, H, W)
    assert jnp.allclose(out, ref, atol=1e-4, rtol=1e-4), "mismatch vs reference"

    print("KERNEL_OK")
</pallas_src>

<mosaic_0001>
module attributes {stable_mosaic.version = 11 : i64} {
  func.func @_depthwise_kernel(%arg0: i32, %arg1: i32, %arg2: memref<1x18x18x4xf32, #tpu.memory_space<vmem>>, %arg3: memref<9x4xf32, #tpu.memory_space<vmem>>, %arg4: memref<1x16x16x4xf32, #tpu.memory_space<vmem>>) attributes {dimension_semantics = [#tpu.dimension_semantics<parallel>, #tpu.dimension_semantics<parallel>], iteration_bounds = array<i64: 2, 1>, scalar_prefetch = 0 : i64, scratch_operands = 0 : i64, tpu.core_type = #tpu.core_type<tc>, window_params = [{transform_indices = @transform_0, window_bounds = array<i64: 1, 18, 18, 4>}, {transform_indices = @transform_1, window_bounds = array<i64: 9, 4>}, {transform_indices = @transform_2, window_bounds = array<i64: 1, 16, 16, 4>}]} {
    %cst = arith.constant 0.000000e+00 : f32
    %0 = vector.broadcast %cst : f32 to vector<16x16x4xf32>
    %c0 = arith.constant 0 : index
    %c0_0 = arith.constant 0 : index
    %c0_1 = arith.constant 0 : index
    %c0_2 = arith.constant 0 : index
    %1 = vector.load %arg2[%c0, %c0_0, %c0_1, %c0_2] : memref<1x18x18x4xf32, #tpu.memory_space<vmem>>, vector<1x16x16x4xf32>
    %2 = vector.shape_cast %1 : vector<1x16x16x4xf32> to vector<16x16x4xf32>
    %c0_3 = arith.constant 0 : index
    %c0_4 = arith.constant 0 : index
    %3 = vector.load %arg3[%c0_3, %c0_4] : memref<9x4xf32, #tpu.memory_space<vmem>>, vector<1x4xf32>
    %4 = vector.shape_cast %3 : vector<1x4xf32> to vector<1x1x4xf32>
    %5 = vector.broadcast %4 : vector<1x1x4xf32> to vector<16x16x4xf32>
    %6 = arith.mulf %2, %5 : vector<16x16x4xf32>
    %7 = arith.addf %0, %6 : vector<16x16x4xf32>
    %c0_5 = arith.constant 0 : index
    %c0_6 = arith.constant 0 : index
    %c1 = arith.constant 1 : index
    %c0_7 = arith.constant 0 : index
    %8 = vector.load %arg2[%c0_5, %c0_6, %c1, %c0_7] : memref<1x18x18x4xf32, #tpu.memory_space<vmem>>, vector<1x16x16x4xf32>
    %9 = vector.shape_cast %8 : vector<1x16x16x4xf32> to vector<16x16x4xf32>
    %c1_8 = arith.constant 1 : index
    %c0_9 = arith.constant 0 : index
    %10 = vector.load %arg3[%c1_8, %c0_9] : memref<9x4xf32, #tpu.memory_space<vmem>>, vector<1x4xf32>
    %11 = vector.shape_cast %10 : vector<1x4xf32> to vector<1x1x4xf32>
    %12 = vector.broadcast %11 : vector<1x1x4xf32> to vector<16x16x4xf32>
    %13 = arith.mulf %9, %12 : vector<16x16x4xf32>
    %14 = arith.addf %7, %13 : vector<16x16x4xf32>
    %c0_10 = arith.constant 0 : index
    %c0_11 = arith.constant 0 : index
    %c2 = arith.constant 2 : index
    %c0_12 = arith.constant 0 : index
    %15 = vector.load %arg2[%c0_10, %c0_11, %c2, %c0_12] : memref<1x18x18x4xf32, #tpu.memory_space<vmem>>, vector<1x16x16x4xf32>
    %16 = vector.shape_cast %15 : vector<1x16x16x4xf32> to vector<16x16x4xf32>
    %c2_13 = arith.constant 2 : index
    %c0_14 = arith.constant 0 : index
    %17 = vector.load %arg3[%c2_13, %c0_14] : memref<9x4xf32, #tpu.memory_space<vmem>>, vector<1x4xf32>
    %18 = vector.shape_cast %17 : vector<1x4xf32> to vector<1x1x4xf32>
    %19 = vector.broadcast %18 : vector<1x1x4xf32> to vector<16x16x4xf32>
    %20 = arith.mulf %16, %19 : vector<16x16x4xf32>
    %21 = arith.addf %14, %20 : vector<16x16x4xf32>
    %c0_15 = arith.constant 0 : index
    %c1_16 = arith.constant 1 : index
    %c0_17 = arith.constant 0 : index
    %c0_18 = arith.constant 0 : index
    %22 = vector.load %arg2[%c0_15, %c1_16, %c0_17, %c0_18] : memref<1x18x18x4xf32, #tpu.memory_space<vmem>>, vector<1x16x16x4xf32>
    %23 = vector.shape_cast %22 : vector<1x16x16x4xf32> to vector<16x16x4xf32>
    %c3 = arith.constant 3 : index
    %c0_19 = arith.constant 0 : index
    %24 = vector.load %arg3[%c3, %c0_19] : memref<9x4xf32, #tpu.memory_space<vmem>>, vector<1x4xf32>
    %25 = vector.shape_cast %24 : vector<1x4xf32> to vector<1x1x4xf32>
    %26 = vector.broadcast %25 : vector<1x1x4xf32> to vector<16x16x4xf32>
    %27 = arith.mulf %23, %26 : vector<16x16x4xf32>
    %28 = arith.addf %21, %27 : vector<16x16x4xf32>
    %c0_20 = arith.constant 0 : index
    %c1_21 = arith.constant 1 : index
    %c1_22 = arith.constant 1 : index
    %c0_23 = arith.constant 0 : index
    %29 = vector.load %arg2[%c0_20, %c1_21, %c1_22, %c0_23] : memref<1x18x18x4xf32, #tpu.memory_space<vmem>>, vector<1x16x16x4xf32>
    %30 = vector.shape_cast %29 : vector<1x16x16x4xf32> to vector<16x16x4xf32>
    %c4 = arith.constant 4 : index
    %c0_24 = arith.constant 0 : index
    %31 = vector.load %arg3[%c4, %c0_24] : memref<9x4xf32, #tpu.memory_space<vmem>>, vector<1x4xf32>
    %32 = vector.shape_cast %31 : vector<1x4xf32> to vector<1x1x4xf32>
    %33 = vector.broadcast %32 : vector<1x1x4xf32> to vector<16x16x4xf32>
    %34 = arith.mulf %30, %33 : vector<16x16x4xf32>
    %35 = arith.addf %28, %34 : vector<16x16x4xf32>
    %c0_25 = arith.constant 0 : index
    %c1_26 = arith.constant 1 : index
    %c2_27 = arith.constant 2 : index
    %c0_28 = arith.constant 0 : index
    %36 = vector.load %arg2[%c0_25, %c1_26, %c2_27, %c0_28] : memref<1x18x18x4xf32, #tpu.memory_space<vmem>>, vector<1x16x16x4xf32>
    %37 = vector.shape_cast %36 : vector<1x16x16x4xf32> to vector<16x16x4xf32>
    %c5 = arith.constant 5 : index
    %c0_29 = arith.constant 0 : index
    %38 = vector.load %arg3[%c5, %c0_29] : memref<9x4xf32, #tpu.memory_space<vmem>>, vector<1x4xf32>
    %39 = vector.shape_cast %38 : vector<1x4xf32> to vector<1x1x4xf32>
    %40 = vector.broadcast %39 : vector<1x1x4xf32> to vector<16x16x4xf32>
    %41 = arith.mulf %37, %40 : vector<16x16x4xf32>
    %42 = arith.addf %35, %41 : vector<16x16x4xf32>
    %c0_30 = arith.constant 0 : index
    %c2_31 = arith.constant 2 : index
    %c0_32 = arith.constant 0 : index
    %c0_33 = arith.constant 0 : index
    %43 = vector.load %arg2[%c0_30, %c2_31, %c0_32, %c0_33] : memref<1x18x18x4xf32, #tpu.memory_space<vmem>>, vector<1x16x16x4xf32>
    %44 = vector.shape_cast %43 : vector<1x16x16x4xf32> to vector<16x16x4xf32>
    %c6 = arith.constant 6 : index
    %c0_34 = arith.constant 0 : index
    %45 = vector.load %arg3[%c6, %c0_34] : memref<9x4xf32, #tpu.memory_space<vmem>>, vector<1x4xf32>
    %46 = vector.shape_cast %45 : vector<1x4xf32> to vector<1x1x4xf32>
    %47 = vector.broadcast %46 : vector<1x1x4xf32> to vector<16x16x4xf32>
    %48 = arith.mulf %44, %47 : vector<16x16x4xf32>
    %49 = arith.addf %42, %48 : vector<16x16x4xf32>
    %c0_35 = arith.constant 0 : index
    %c2_36 = arith.constant 2 : index
    %c1_37 = arith.constant 1 : index
    %c0_38 = arith.constant 0 : index
    %50 = vector.load %arg2[%c0_35, %c2_36, %c1_37, %c0_38] : memref<1x18x18x4xf32, #tpu.memory_space<vmem>>, vector<1x16x16x4xf32>
    %51 = vector.shape_cast %50 : vector<1x16x16x4xf32> to vector<16x16x4xf32>
    %c7 = arith.constant 7 : index
    %c0_39 = arith.constant 0 : index
    %52 = vector.load %arg3[%c7, %c0_39] : memref<9x4xf32, #tpu.memory_space<vmem>>, vector<1x4xf32>
    %53 = vector.shape_cast %52 : vector<1x4xf32> to vector<1x1x4xf32>
    %54 = vector.broadcast %53 : vector<1x1x4xf32> to vector<16x16x4xf32>
    %55 = arith.mulf %51, %54 : vector<16x16x4xf32>
    %56 = arith.addf %49, %55 : vector<16x16x4xf32>
    %c0_40 = arith.constant 0 : index
    %c2_41 = arith.constant 2 : index
    %c2_42 = arith.constant 2 : index
    %c0_43 = arith.constant 0 : index
    %57 = vector.load %arg2[%c0_40, %c2_41, %c2_42, %c0_43] : memref<1x18x18x4xf32, #tpu.memory_space<vmem>>, vector<1x16x16x4xf32>
    %58 = vector.shape_cast %57 : vector<1x16x16x4xf32> to vector<16x16x4xf32>
    %c8 = arith.constant 8 : index
    %c0_44 = arith.constant 0 : index
    %59 = vector.load %arg3[%c8, %c0_44] : memref<9x4xf32, #tpu.memory_space<vmem>>, vector<1x4xf32>
    %60 = vector.shape_cast %59 : vector<1x4xf32> to vector<1x1x4xf32>
    %61 = vector.broadcast %60 : vector<1x1x4xf32> to vector<16x16x4xf32>
    %62 = arith.mulf %58, %61 : vector<16x16x4xf32>
    %63 = arith.addf %56, %62 : vector<16x16x4xf32>
    %c0_45 = arith.constant 0 : index
    %c0_46 = arith.constant 0 : index
    %c0_47 = arith.constant 0 : index
    %c0_48 = arith.constant 0 : index
    %64 = vector.load %arg4[%c0_45, %c0_46, %c0_47, %c0_48] : memref<1x16x16x4xf32, #tpu.memory_space<vmem>>, vector<1x16x16x4xf32>
    %65 = vector.shape_cast %64 : vector<1x16x16x4xf32> to vector<16x16x4xf32>
    %66 = vector.shape_cast %63 : vector<16x16x4xf32> to vector<1x16x16x4xf32>
    tpu.vector_store %arg4[%c0_45, %c0_46, %c0_47, %c0_48], %66 {strides = array<i32>} : memref<1x16x16x4xf32, #tpu.memory_space<vmem>>, vector<1x16x16x4xf32>,
    return
  }
  func.func @transform_0(%arg0: i32, %arg1: i32) -> (i32, i32, i32, i32) {
    %c0_i32 = arith.constant 0 : i32
    %c0_i32_0 = arith.constant 0 : i32
    %c0_i32_1 = arith.constant 0 : i32
    return %arg0, %c0_i32, %c0_i32_0, %arg1 : i32, i32, i32, i32
  }
  func.func @transform_1(%arg0: i32, %arg1: i32) -> (i32, i32) {
    %c0_i32 = arith.constant 0 : i32
    %c0_i32_0 = arith.constant 0 : i32
    return %c0_i32, %arg1 : i32, i32
  }
  func.func @transform_2(%arg0: i32, %arg1: i32) -> (i32, i32, i32, i32) {
    %c0_i32 = arith.constant 0 : i32
    %c0_i32_0 = arith.constant 0 : i32
    %c0_i32_1 = arith.constant 0 : i32
    return %arg0, %c0_i32, %c0_i32_0, %arg1 : i32, i32, i32, i32
  }
}

</mosaic_0001>

<bundles_post_ra>
// kernel: tpu_custom_call.1
= control target key start
LH: loop header
LB: loop body
LE: loop exit
PB: predicated region body
PF: predicated region fallthrough
CT: control target
= control target key end

     0   :  { %s1521_s9 = smov 0   ;;  %s1523_s10 = smov 0   ;;  %s2117_s0 = inlined_call_operand.vmem [shape: f32[2,18,18,4], index: 0, kind: input, shape index: {}]   ;;  %s2118_s1 = inlined_call_operand.vmem [shape: f32[9,4], index: 1, kind: input, shape index: {}]   ;;  %s2119_s2 = inlined_call_operand.vmem [shape: f32[2,16,16,4], index: 2, kind: output, shape index: {}]  }
   0x1   :  { %s1525_s11 = smov 0  }
   0x2 LB: > { %s24_s12 = sadd.s32 1, %s1500_s10  ;;  %p1240_p0 = scmp.ge.s32.totalorder %s1504_s11, 1  ;;  %s1504_s11 = sphi %s1525_s11, %s12_s11   ;;  %s1500_s10 = sphi %s1523_s10, %s2121_s10   ;;  %s1496_s9 = sphi %s1521_s9, %s2120_s9  }
   0x3   : > { %p26_p1 = scmp.ge.s32.totalorder %s24_s12, 2  ;;  %p140_p2 = scmp.lt.s32.totalorder %s1504_s11, 3 }
   0x5   : > { %s2123_s12 = smov (%p26_p1, %s24_s12), 0  ;;  %p141_p3 = pnand %p1240_p0, %p140_p2 }
   0x6   : > { %p172_p4 = scmp.lt.s32.totalorder (!%p141_p3), %s1496_s9, 1  ;;  %v1545_v0 = vld [vmem:[%s2118_s1] ss:$0 sm:$0xff] (!%p141_p3)  ;;  %v1550_v1 = vld [vmem:[%s2118_s1 + $0x1] ss:$0 sm:$0xff] (!%p141_p3)  ;;  %vm1103_vm0 = vcmask (!%p141_p3), 31744  }
   0x7   : > { %144 = sbr.rel (%p141_p3) target bundleno = 165 (0xa5), region = 28  ;;  %v1555_v2 = vld [vmem:[%s2118_s1 + $0x2] ss:$0 sm:$0xff] (!%p141_p3)  ;;  %v1565_v3 = vld [vmem:[%s2118_s1 + $0x3] ss:$0 sm:$0xff] (!%p141_p3) }
   0x8   : > { %v1570_v4 = vld [vmem:[%s2118_s1 + $0x4] ss:$0 sm:$0xff] (!%p141_p3)  ;;  %v1583_v13 = vld [vmem:[%s2118_s1 + $0x5] ss:$0 sm:$0xff] (!%p141_p3)  ;;  %v1588_v14 = vld [vmem:[%s2118_s1 + $0x6] ss:$0 sm:$0xff] (!%p141_p3) }
   0x9   : > { %v1593_v15 = vld [vmem:[%s2118_s1 + $0x7] ss:$0 sm:$0xff] (!%p141_p3)  ;;  %v1598_v16 = vld [vmem:[%s2118_s1 + $0x8] ss:$0 sm:$0xff] (!%p141_p3) }
   0xe   : > { %s2125_s9 = smov (!%p172_p4, %s1496_s9), 1 }
   0xf   : > { %s1448_s13 = smul.u32 432, %s2125_s9  ;;  %s1447_s7 = sshll.u32 %s2125_s9, 8 }
  0x11   : > { %s1560_s22 = scalar_lea.vmem %s2117_s0, %s1448_s13  ;;  %s1656_s13 = scalar_lea.vmem %s2119_s2, %s1447_s7 }
  0x12   : > { %v192_v5 = vld [vmem:[%s1560_s22] sm:$0xff]  ;;  %v1247_v11 = vld [vmem:[%s1560_s22 + $0x18] sm:$0xff]  ;;  %v193_v20 = vld [vmem:[%s1560_s22 + $0x8] sm:$0xff] }
  0x13   : > { %v293_v6 = vld [vmem:[%s1560_s22 + $0x1] sm:$0xff]  ;;  %v229_v8 = vmul.f32 %v1545_v0, %v192_v5  ;;  %v1280_v12 = vld [vmem:[%s1560_s22 + $0x19] sm:$0xff]  ;;  %v533_v18 = vmul.f32 %v1565_v3, %v1247_v11  ;;  %v294_v21 = vld [vmem:[%s1560_s22 + $0x9] sm:$0xff]  ;;  %v231_v23 = vmul.f32 %v1247_v11, %v1545_v0  ;;  %v230_v27 = vmul.f32 %v1545_v0, %v193_v20 }
  0x14   : > { %v394_v7 = vld [vmem:[%s1560_s22 + $0x2] sm:$0xff]  ;;  %v330_v9 = vmul.f32 %v1550_v1, %v293_v6  ;;  %v634_v19 = vmul.f32 %v1570_v4, %v1280_v12  ;;  %v395_v22 = vld [vmem:[%s1560_s22 + $0xa] sm:$0xff]  ;;  %v1313_v24 = vld [vmem:[%s1560_s22 + $0x1a] sm:$0xff]  ;;  %v331_v28 = vmul.f32 %v1550_v1, %v294_v21  ;;  %v332_v30 = vmul.f32 %v1280_v12, %v1550_v1 }
  0x15   : > { %v431_v10 = vmul.f32 %v1555_v2, %v394_v7  ;;  %v1346_v25 = vld [vmem:[%s1560_s22 + $0x30] sm:$0xff]  ;;  %v432_v29 = vmul.f32 %v1555_v2, %v395_v22  ;;  %v735_v32 = vmul.f32 %v1583_v13, %v1313_v24  ;;  %v1248_v36 = vld [vmem:[%s1560_s22 + $0x20] sm:$0xff]  ;;  %v1347_v44 = vld [vmem:[%s1560_s22 + $0x38] sm:$0xff]  ;;  %v433_v47 = vmul.f32 %v1313_v24, %v1555_v2 }
  0x16   : > { %v362_v17 = vadd.f32 %v330_v9, %v229_v8  ;;  %v1379_v26 = vld [vmem:[%s1560_s22 + $0x31] sm:$0xff]  ;;  %v837_v33 = vmul.f32 %v1588_v14, %v1346_v25  ;;  %v1281_v37 = vld [vmem:[%s1560_s22 + $0x21] sm:$0xff]  ;;  %v363_v39 = vadd.f32 %v331_v28, %v230_v27  ;;  %v534_v40 = vmul.f32 %v1565_v3, %v1248_v36  ;;  %v1380_v45 = vld [vmem:[%s1560_s22 + $0x39] sm:$0xff] }
  0x17   : > { %v938_v34 = vmul.f32 %v1593_v15, %v1379_v26  ;;  %v1412_v35 = vld [vmem:[%s1560_s22 + $0x32] sm:$0xff]  ;;  %v635_v41 = vmul.f32 %v1570_v4, %v1281_v37  ;;  %v1314_v43 = vld [vmem:[%s1560_s22 + $0x22] sm:$0xff]  ;;  %v364_v46 = vadd.f32 %v332_v30, %v231_v23  ;;  %v535_v48 = vmul.f32 %v1346_v25, %v1565_v3  ;;  %v1413_v53 = vld [vmem:[%s1560_s22 + $0x3a] sm:$0xff] }
  0x18   : > { %v463_v31 = vadd.f32 %v431_v10, %v362_v17  ;;  %v1039_v38 = vmul.f32 %v1598_v16, %v1412_v35  ;;  %v464_v49 = vadd.f32 %v432_v29, %v363_v39  ;;  %v736_v50 = vmul.f32 %v1583_v13, %v1314_v43  ;;  %v1634_v59 = vld [vmem:[%s1560_s22 + $0x48] sm:$0xff] }
  0x19   : > { %v838_v51 = vmul.f32 %v1588_v14, %v1347_v44  ;;  %v939_v52 = vmul.f32 %v1593_v15, %v1380_v45  ;;  %v1040_v55 = vmul.f32 %v1598_v16, %v1413_v53  ;;  %v465_v56 = vadd.f32 %v433_v47, %v364_v46  ;;  %v1381_v8 = vld [vmem:[%s1560_s22 + $0x49] sm:$0xff] }
  0x1a   : > { %v565_v42 = vadd.f32 %v533_v18, %v463_v31  ;;  %v636_v57 = vmul.f32 %v1379_v26, %v1570_v4  ;;  %v566_v58 = vadd.f32 %v534_v40, %v464_v49  ;;  %v232_v60 = vmul.f32 %v1248_v36, %v1545_v0  ;;  %v1414_v11 = vld [vmem:[%s1560_s22 + $0x4a] sm:$0xff] }
  0x1b   : > { %v333_v61 = vmul.f32 %v1281_v37, %v1550_v1  ;;  %v434_v62 = vmul.f32 %v1314_v43, %v1555_v2  ;;  %v567_v5 = vadd.f32 %v535_v48, %v465_v56  ;;  %v737_v6 = vmul.f32 %v1412_v35, %v1583_v13  ;;  %v1349_v36 = vld [vmem:[%s1560_s22 + $0x50] sm:$0xff] }
  0x1c   : > { %v666_v54 = vadd.f32 %v634_v19, %v565_v42  ;;  %v839_v7 = vmul.f32 %v1588_v14, %v1634_v59  ;;  %v667_v9 = vadd.f32 %v635_v41, %v566_v58  ;;  %v940_v10 = vmul.f32 %v1593_v15, %v1381_v8  ;;  %v1382_v37 = vld [vmem:[%s1560_s22 + $0x51] sm:$0xff]  ;;  %v1350_v58 = vld [vmem:[%s1560_s22 + $0x60] sm:$0xff] }
  0x1d   : > { %v365_v12 = vadd.f32 %v333_v61, %v232_v60  ;;  %v536_v17 = vmul.f32 %v1347_v44, %v1565_v3  ;;  %v668_v19 = vadd.f32 %v636_v57, %v567_v5  ;;  %v1041_v20 = vmul.f32 %v1598_v16, %v1414_v11  ;;  %v1415_v57 = vld [vmem:[%s1560_s22 + $0x52] sm:$0xff] }
  0x1e   : > { %v767_v63 = vadd.f32 %v735_v32, %v666_v54  ;;  %v637_v21 = vmul.f32 %v1380_v45, %v1570_v4  ;;  %v768_v22 = vadd.f32 %v736_v50, %v667_v9  ;;  %v233_v24 = vmul.f32 %v1346_v25, %v1545_v0 }
  0x1f   : > { %v466_v23 = vadd.f32 %v434_v62, %v365_v12  ;;  %v334_v27 = vmul.f32 %v1379_v26, %v1550_v1  ;;  %v769_v29 = vadd.f32 %v737_v6, %v668_v19  ;;  %v738_v30 = vmul.f32 %v1413_v53, %v1583_v13  ;;  %v1416_v12 = vld [vmem:[%s1560_s22 + $0x62] sm:$0xff] }
  0x20   : > { %v869_v18 = vadd.f32 %v837_v33, %v767_v63  ;;  %v435_v31 = vmul.f32 %v1412_v35, %v1555_v2  ;;  %v870_v32 = vadd.f32 %v838_v51, %v768_v22  ;;  %v537_v25 = vmul.f32 %v1634_v59, %v1565_v3 }
  0x21   : > { %v568_v33 = vadd.f32 %v536_v17, %v466_v23  ;;  %v366_v39 = vadd.f32 %v334_v27, %v233_v24  ;;  %v840_v40 = vmul.f32 %v1588_v14, %v1349_v36  ;;  %v941_v35 = vmul.f32 %v1593_v15, %v1382_v37  ;;  %v1351_v24 = vld [vmem:[%s1560_s22 + $0x68] sm:$0xff] }
  0x22   : > { %v970_v28 = vadd.f32 %v938_v34, %v869_v18  ;;  %v871_v34 = vadd.f32 %v839_v7, %v769_v29  ;;  %v971_v41 = vadd.f32 %v939_v52, %v870_v32  ;;  %v638_v46 = vmul.f32 %v1381_v8, %v1570_v4  ;;  %v1417_v32 = vld [vmem:[%s1560_s22 + $0x6a] sm:$0xff] }
  0x23   : > { %v669_v42 = vadd.f32 %v637_v21, %v568_v33  ;;  %v467_v43 = vadd.f32 %v435_v31, %v366_v39  ;;  %v739_v48 = vmul.f32 %v1414_v11, %v1583_v13  ;;  %v335_v49 = vmul.f32 %v1380_v45, %v1550_v1  ;;  %v1384_v31 = vld [vmem:[%s1560_s22 + $0x69] sm:$0xff] }
  0x24   : > { %v1071_v26 = vadd.f32 %v1039_v38, %v970_v28  ;;  %v972_v47 = vadd.f32 %v940_v10, %v871_v34  ;;  %v234_v38 = vmul.f32 %v1347_v44, %v1545_v0  ;;  %v1072_v50 = vadd.f32 %v1040_v55, %v971_v41  ;;  %v1383_v55 = vld [vmem:[%s1560_s22 + $0x61] sm:$0xff] }
  0x25   : > { %v770_v51 = vadd.f32 %v738_v30, %v669_v42  ;;  %v569_v54 = vadd.f32 %v537_v25, %v467_v43  ;;  %v436_v52 = vmul.f32 %v1413_v53, %v1555_v2  ;;  %v538_v61 = vmul.f32 %v1349_v36, %v1565_v3  ;;  %v1352_v42 = vld [vmem:[%s1560_s22 + $0x78] sm:$0xff] }
  0x26   : > { %1104 = vst.msk [vmem:[%s1656_s13] sm:$0xff] %vm1103_vm0, %v1071_v26  ;;  %v1073_v56 = vadd.f32 %v1041_v20, %v972_v47  ;;  %v367_v60 = vadd.f32 %v335_v49, %v234_v38  ;;  %1105 = vst.msk [vmem:[%s1656_s13 + $0x8] sm:$0xff] %vm1103_vm0, %v1072_v50  ;;  %v1042_v44 = vmul.f32 %v1598_v16, %v1415_v57  ;;  %v1385_v50 = vld [vmem:[%s1560_s22 + $0x79] sm:$0xff] }
  0x27   : > { %v872_v62 = vadd.f32 %v840_v40, %v770_v51  ;;  %v670_v63 = vadd.f32 %v638_v46, %v569_v54  ;;  %v841_v45 = vmul.f32 %v1588_v14, %v1350_v58  ;;  %v942_v53 = vmul.f32 %v1593_v15, %v1383_v55  ;;  %v1418_v51 = vld [vmem:[%s1560_s22 + $0x7a] sm:$0xff] }
  0x28   : > { %1106 = vst.msk [vmem:[%s1656_s13 + $0x10] sm:$0xff] %vm1103_vm0, %v1073_v56  ;;  %v468_v5 = vadd.f32 %v436_v52, %v367_v60  ;;  %v639_v6 = vmul.f32 %v1382_v37, %v1570_v4  ;;  %v235_v7 = vmul.f32 %v1634_v59, %v1545_v0  ;;  %v336_v17 = vmul.f32 %v1381_v8, %v1550_v1 }
  0x29   : > { %v973_v9 = vadd.f32 %v941_v35, %v872_v62  ;;  %v771_v10 = vadd.f32 %v739_v48, %v670_v63  ;;  %v437_v18 = vmul.f32 %v1414_v11, %v1555_v2  ;;  %v1043_v19 = vmul.f32 %v1598_v16, %v1416_v12  ;;  %v1353_v63 = vld [vmem:[%s1560_s22 + $0x80] sm:$0xff] }
  0x2a   : > { %v570_v20 = vadd.f32 %v538_v61, %v468_v5  ;;  %v740_v21 = vmul.f32 %v1415_v57, %v1583_v13  ;;  %v368_v27 = vadd.f32 %v336_v17, %v235_v7  ;;  %v539_v59 = vmul.f32 %v1350_v58, %v1565_v3 }
  0x2b   : > { %v1074_v22 = vadd.f32 %v1042_v44, %v973_v9  ;;  %v873_v23 = vadd.f32 %v841_v45, %v771_v10  ;;  %v842_v29 = vmul.f32 %v1588_v14, %v1351_v24  ;;  %v640_v8 = vmul.f32 %v1383_v55, %v1570_v4 }
  0x2c   : > { %v671_v28 = vadd.f32 %v639_v6, %v570_v20  ;;  %v236_v11 = vmul.f32 %v1349_v36, %v1545_v0  ;;  %v469_v33 = vadd.f32 %v437_v18, %v368_v27  ;;  %v337_v39 = vmul.f32 %v1382_v37, %v1550_v1  ;;  %v1419_v27 = vld [vmem:[%s1560_s22 + $0x82] sm:$0xff] }
  0x2d   : > { %1107 = vst.msk [vmem:[%s1656_s13 + $0x18] sm:$0xff] %vm1103_vm0, %v1074_v22  ;;  %v974_v30 = vadd.f32 %v942_v53, %v873_v23  ;;  %v438_v25 = vmul.f32 %v1415_v57, %v1555_v2  ;;  %v943_v34 = vmul.f32 %v1593_v15, %v1384_v31  ;;  %v1044_v40 = vmul.f32 %v1598_v16, %v1417_v32 }
  0x2e   : > { %v772_v26 = vadd.f32 %v740_v21, %v671_v28  ;;  %v741_v36 = vmul.f32 %v1416_v12, %v1583_v13  ;;  %v571_v41 = vadd.f32 %v539_v59, %v469_v33  ;;  %v369_v43 = vadd.f32 %v337_v39, %v236_v11  ;;  %v1354_v28 = vld [vmem:[%s1560_s22 + $0x90] sm:$0xff] }
  0x2f   : > { %v1075_v35 = vadd.f32 %v1043_v19, %v974_v30  ;;  %v540_v46 = vmul.f32 %v1351_v24, %v1565_v3  ;;  %v843_v37 = vmul.f32 %v1588_v14, %v1352_v42  ;;  %v641_v48 = vmul.f32 %v1384_v31, %v1570_v4 }
  0x30   : > { %v874_v47 = vadd.f32 %v842_v29, %v772_v26  ;;  %v237_v38 = vmul.f32 %v1350_v58, %v1545_v0  ;;  %v672_v49 = vadd.f32 %v640_v8, %v571_v41  ;;  %v470_v54 = vadd.f32 %v438_v25, %v369_v43  ;;  %v1387_v25 = vld [vmem:[%s1560_s22 + $0x91] sm:$0xff] }
  0x31   : > { %1108 = vst.msk [vmem:[%s1656_s13 + $0x20] sm:$0xff] %vm1103_vm0, %v1075_v35  ;;  %v338_v52 = vmul.f32 %v1383_v55, %v1550_v1  ;;  %v439_v56 = vmul.f32 %v1416_v12, %v1555_v2  ;;  %v944_v60 = vmul.f32 %v1593_v15, %v1385_v50  ;;  %v1045_v61 = vmul.f32 %v1598_v16, %v1418_v51  ;;  %v1386_v12 = vld [vmem:[%s1560_s22 + $0x81] sm:$0xff]  ;;  %v1420_v26 = vld [vmem:[%s1560_s22 + $0x92] sm:$0xff] }
  0x32   : > { %v975_v57 = vadd.f32 %v943_v34, %v874_v47  ;;  %v742_v62 = vmul.f32 %v1417_v32, %v1583_v13  ;;  %v773_v58 = vadd.f32 %v741_v36, %v672_v49  ;;  %v572_v44 = vadd.f32 %v540_v46, %v470_v54 }
  0x33   : > { %v370_v45 = vadd.f32 %v338_v52, %v237_v38  ;;  %v541_v53 = vmul.f32 %v1352_v42, %v1565_v3  ;;  %v844_v55 = vmul.f32 %v1588_v14, %v1353_v63  ;;  %v642_v6 = vmul.f32 %v1385_v50, %v1570_v4 }
  0x34   : > { %v1076_v5 = vadd.f32 %v1044_v40, %v975_v57  ;;  %v238_v7 = vmul.f32 %v1351_v24, %v1545_v0  ;;  %v875_v9 = vadd.f32 %v843_v37, %v773_v58  ;;  %v673_v10 = vadd.f32 %v641_v48, %v572_v44  ;;  %v1355_v37 = vld [vmem:[%s1560_s22 + $0x98] sm:$0xff] }
  0x35   : > { %v471_v17 = vadd.f32 %v439_v56, %v370_v45  ;;  %v339_v18 = vmul.f32 %v1384_v31, %v1550_v1  ;;  %v945_v19 = vmul.f32 %v1593_v15, %v1386_v12  ;;  %v743_v20 = vmul.f32 %v1418_v51, %v1583_v13  ;;  %v1388_v48 = vld [vmem:[%s1560_s22 + $0x99] sm:$0xff] }
  0x36   : > { %1109 = vst.msk [vmem:[%s1656_s13 + $0x28] sm:$0xff] %vm1103_vm0, %v1076_v5  ;;  %v440_v21 = vmul.f32 %v1417_v32, %v1555_v2  ;;  %v542_v22 = vmul.f32 %v1353_v63, %v1565_v3  ;;  %v976_v23 = vadd.f32 %v944_v60, %v875_v9  ;;  %v774_v24 = vadd.f32 %v742_v62, %v673_v10  ;;  %v1421_v60 = vld [vmem:[%s1560_s22 + $0x9a] sm:$0xff] }
  0x37   : > { %v573_v59 = vadd.f32 %v541_v53, %v471_v17  ;;  %v371_v29 = vadd.f32 %v339_v18, %v238_v7  ;;  %v1046_v8 = vmul.f32 %v1598_v16, %v1419_v27  ;;  %v845_v11 = vmul.f32 %v1588_v14, %v1354_v28 }
  0x38   : > { %v643_v30 = vmul.f32 %v1386_v12, %v1570_v4  ;;  %v239_v31 = vmul.f32 %v1352_v42, %v1545_v0  ;;  %v1077_v32 = vadd.f32 %v1045_v61, %v976_v23  ;;  %v876_v33 = vadd.f32 %v844_v55, %v774_v24 }
  0x39   : > { %v674_v39 = vadd.f32 %v642_v6, %v573_v59  ;;  %v472_v34 = vadd.f32 %v440_v21, %v371_v29  ;;  %v946_v40 = vmul.f32 %v1593_v15, %v1387_v25  ;;  %v1047_v36 = vmul.f32 %v1598_v16, %v1420_v26  ;;  %v1389_v21 = vld [vmem:[%s1560_s22 + $0xa9] sm:$0xff] }
  0x3a   : > { %v340_v35 = vmul.f32 %v1385_v50, %v1550_v1  ;;  %v441_v41 = vmul.f32 %v1418_v51, %v1555_v2  ;;  %1110 = vst.msk [vmem:[%s1656_s13 + $0x30] sm:$0xff] %vm1103_vm0, %v1077_v32  ;;  %v977_v42 = vadd.f32 %v945_v19, %v876_v33  ;;  %v744_v47 = vmul.f32 %v1419_v27, %v1583_v13 }
  0x3b   : > { %v775_v43 = vadd.f32 %v743_v20, %v674_v39  ;;  %v574_v46 = vadd.f32 %v542_v22, %v472_v34  ;;  %v846_v38 = vmul.f32 %v1588_v14, %v1355_v37  ;;  %v947_v49 = vmul.f32 %v1593_v15, %v1388_v48  ;;  %v1422_v22 = vld [vmem:[%s1560_s22 + $0xaa] sm:$0xff] }
  0x3c   : > { %v372_v54 = vadd.f32 %v340_v35, %v239_v31  ;;  %v543_v50 = vmul.f32 %v1354_v28, %v1565_v3  ;;  %v1078_v51 = vadd.f32 %v1046_v8, %v977_v42  ;;  %v240_v57 = vmul.f32 %v1353_v63, %v1545_v0  ;;  %v1356_v63 = vld [vmem:[%s1560_s22 + $0xa8] sm:$0xff]  ;;  %v1357_v31 = vld [vmem:[%s1560_s22 + $0xb0] sm:$0xff] }
  0x3d   : > { %v877_v52 = vadd.f32 %v845_v11, %v775_v43  ;;  %v675_v56 = vadd.f32 %v643_v30, %v574_v46  ;;  %v644_v62 = vmul.f32 %v1387_v25, %v1570_v4  ;;  %v341_v58 = vmul.f32 %v1386_v12, %v1550_v1  ;;  %v1390_v35 = vld [vmem:[%s1560_s22 + $0xb1] sm:$0xff] }
  0x3e   : > { %v473_v61 = vadd.f32 %v441_v41, %v372_v54  ;;  %v442_v44 = vmul.f32 %v1419_v27, %v1555_v2  ;;  %1111 = vst.msk [vmem:[%s1656_s13 + $0x38] sm:$0xff] %vm1103_vm0, %v1078_v51  ;;  %v1048_v5 = vmul.f32 %v1598_v16, %v1421_v60  ;;  %v745_v55 = vmul.f32 %v1420_v26, %v1583_v13  ;;  %v1423_v54 = vld [vmem:[%s1560_s22 + $0xb2] sm:$0xff]  ;;  %v1358_v51 = vld [vmem:[%s1560_s22 + $0xc0] sm:$0xff] }
  0x3f   : > { %v978_v45 = vadd.f32 %v946_v40, %v877_v52  ;;  %v776_v53 = vadd.f32 %v744_v47, %v675_v56  ;;  %v847_v7 = vmul.f32 %v1588_v14, %v1356_v63  ;;  %v373_v9 = vadd.f32 %v341_v58, %v240_v57 }
  0x40   : > { %v575_v6 = vadd.f32 %v543_v50, %v473_v61  ;;  %v544_v10 = vmul.f32 %v1355_v37, %v1565_v3  ;;  %v645_v18 = vmul.f32 %v1388_v48, %v1570_v4  ;;  %v241_v19 = vmul.f32 %v1354_v28, %v1545_v0 }
  0x41   : > { %v1079_v12 = vadd.f32 %v1047_v36, %v978_v45  ;;  %v878_v17 = vadd.f32 %v846_v38, %v776_v53  ;;  %v474_v23 = vadd.f32 %v442_v44, %v373_v9  ;;  %v342_v24 = vmul.f32 %v1387_v25, %v1550_v1  ;;  %v1391_v44 = vld [vmem:[%s1560_s22 + $0xc1] sm:$0xff] }
  0x42   : > { %v676_v20 = vadd.f32 %v644_v62, %v575_v6  ;;  %v443_v27 = vmul.f32 %v1420_v26, %v1555_v2  ;;  %v948_v29 = vmul.f32 %v1593_v15, %v1389_v21  ;;  %v1049_v8 = vmul.f32 %v1598_v16, %v1422_v22  ;;  %v1424_v45 = vld [vmem:[%s1560_s22 + $0xc2] sm:$0xff] }
  0x43   : > { %1112 = vst.msk [vmem:[%s1656_s13 + $0x40] sm:$0xff] %vm1103_vm0, %v1079_v12  ;;  %v979_v59 = vadd.f32 %v947_v49, %v878_v17  ;;  %v746_v11 = vmul.f32 %v1421_v60, %v1583_v13  ;;  %v576_v30 = vadd.f32 %v544_v10, %v474_v23  ;;  %v374_v32 = vadd.f32 %v342_v24, %v241_v19  ;;  %v1359_v17 = vld [vmem:[%s1560_s22 + $0xc8] sm:$0xff] }
  0x44   : > { %v777_v28 = vadd.f32 %v745_v55, %v676_v20  ;;  %v545_v33 = vmul.f32 %v1356_v63, %v1565_v3  ;;  %v848_v25 = vmul.f32 %v1588_v14, %v1357_v31  ;;  %v646_v26 = vmul.f32 %v1389_v21, %v1570_v4 }
  0x45   : > { %v1080_v39 = vadd.f32 %v1048_v5, %v979_v59  ;;  %v242_v34 = vmul.f32 %v1355_v37, %v1545_v0  ;;  %v677_v36 = vadd.f32 %v645_v18, %v576_v30  ;;  %v475_v41 = vadd.f32 %v443_v27, %v374_v32  ;;  %v1392_v18 = vld [vmem:[%s1560_s22 + $0xc9] sm:$0xff] }
  0x46   : > { %v879_v40 = vadd.f32 %v847_v7, %v777_v28  ;;  %v343_v42 = vmul.f32 %v1388_v48, %v1550_v1  ;;  %v949_v43 = vmul.f32 %v1593_v15, %v1390_v35  ;;  %v747_v46 = vmul.f32 %v1422_v22, %v1583_v13 }
  0x47   : > { %1113 = vst.msk [vmem:[%s1656_s13 + $0x48] sm:$0xff] %vm1103_vm0, %v1080_v39  ;;  %v444_v47 = vmul.f32 %v1421_v60, %v1555_v2  ;;  %v546_v38 = vmul.f32 %v1357_v31, %v1565_v3  ;;  %v778_v37 = vadd.f32 %v746_v11, %v677_v36  ;;  %v577_v50 = vadd.f32 %v545_v33, %v475_v41 }
  0x48   : > { %v980_v49 = vadd.f32 %v948_v29, %v879_v40  ;;  %v375_v52 = vadd.f32 %v343_v42, %v242_v34  ;;  %v1050_v48 = vmul.f32 %v1598_v16, %v1423_v54  ;;  %v849_v56 = vmul.f32 %v1588_v14, %v1358_v51  ;;  %v1425_v29 = vld [vmem:[%s1560_s22 + $0xca] sm:$0xff] }
  0x49   : > { %v647_v57 = vmul.f32 %v1390_v35, %v1570_v4  ;;  %v243_v61 = vmul.f32 %v1356_v63, %v1545_v0  ;;  %v880_v62 = vadd.f32 %v848_v25, %v778_v37  ;;  %v678_v58 = vadd.f32 %v646_v26, %v577_v50 }
  0x4a   : > { %v1081_v60 = vadd.f32 %v1049_v8, %v980_v49  ;;  %v476_v53 = vadd.f32 %v444_v47, %v375_v52  ;;  %v950_v5 = vmul.f32 %v1593_v15, %v1391_v44  ;;  %v1051_v55 = vmul.f32 %v1598_v16, %v1424_v45  ;;  %v1393_v47 = vld [vmem:[%s1560_s22 + $0xd9] sm:$0xff] }
  0x4b   : > { %v344_v6 = vmul.f32 %v1389_v21, %v1550_v1  ;;  %v445_v7 = vmul.f32 %v1422_v22, %v1555_v2  ;;  %v981_v63 = vadd.f32 %v949_v43, %v880_v62  ;;  %v779_v9 = vadd.f32 %v747_v46, %v678_v58 }
  0x4c   : > { %1114 = vst.msk [vmem:[%s1656_s13 + $0x50] sm:$0xff] %vm1103_vm0, %v1081_v60  ;;  %v578_v10 = vadd.f32 %v546_v38, %v476_v53  ;;  %v748_v12 = vmul.f32 %v1423_v54, %v1583_v13  ;;  %v850_v19 = vmul.f32 %v1588_v14, %v1359_v17  ;;  %v951_v20 = vmul.f32 %v1593_v15, %v1392_v18  ;;  %v1426_v38 = vld [vmem:[%s1560_s22 + $0xda] sm:$0xff] }
  0x4d   : > { %v376_v23 = vadd.f32 %v344_v6, %v243_v61  ;;  %v547_v21 = vmul.f32 %v1358_v51, %v1565_v3  ;;  %v1082_v22 = vadd.f32 %v1050_v48, %v981_v63  ;;  %v881_v24 = vadd.f32 %v849_v56, %v779_v9  ;;  %v1361_v61 = vld [vmem:[%s1560_s22 + $0xe0] sm:$0xff] }
  0x4e   : > { %v679_v27 = vadd.f32 %v647_v57, %v578_v10  ;;  %v244_v59 = vmul.f32 %v1357_v31, %v1545_v0  ;;  %v648_v11 = vmul.f32 %v1391_v44, %v1570_v4  ;;  %v345_v28 = vmul.f32 %v1390_v35, %v1550_v1  ;;  %v1360_v31 = vld [vmem:[%s1560_s22 + $0xd8] sm:$0xff]  ;;  %v1394_v6 = vld [vmem:[%s1560_s22 + $0xe1] sm:$0xff] }
  0x4f   : > { %v477_v8 = vadd.f32 %v445_v7, %v376_v23  ;;  %v446_v30 = vmul.f32 %v1423_v54, %v1555_v2  ;;  %1115 = vst.msk [vmem:[%s1656_s13 + $0x58] sm:$0xff] %vm1103_vm0, %v1082_v22  ;;  %v982_v32 = vadd.f32 %v950_v5, %v881_v24  ;;  %v1052_v39 = vmul.f32 %v1598_v16, %v1425_v29  ;;  %v1427_v23 = vld [vmem:[%s1560_s22 + $0xe2] sm:$0xff]  ;;  %v1362_v22 = vld [vmem:[%s1560_s22 + $0xf0] sm:$0xff] }
  0x50   : > { %v780_v33 = vadd.f32 %v748_v12, %v679_v27  ;;  %v749_v25 = vmul.f32 %v1424_v45, %v1583_v13  ;;  %v851_v34 = vmul.f32 %v1588_v14, %v1360_v31  ;;  %v377_v40 = vadd.f32 %v345_v28, %v244_v59 }
  0x51   : > { %v579_v26 = vadd.f32 %v547_v21, %v477_v8  ;;  %v548_v36 = vmul.f32 %v1359_v17, %v1565_v3  ;;  %v1083_v35 = vadd.f32 %v1051_v55, %v982_v32  ;;  %v649_v42 = vmul.f32 %v1392_v18, %v1570_v4  ;;  %v1428_v32 = vld [vmem:[%s1560_s22 + $0xf2] sm:$0xff] }
  0x52   : > { %v882_v41 = vadd.f32 %v850_v19, %v780_v33  ;;  %v245_v43 = vmul.f32 %v1358_v51, %v1545_v0  ;;  %v478_v49 = vadd.f32 %v446_v30, %v377_v40  ;;  %v346_v37 = vmul.f32 %v1391_v44, %v1550_v1  ;;  %v1395_v30 = vld [vmem:[%s1560_s22 + $0xf1] sm:$0xff] }
  0x53   : > { %v680_v46 = vadd.f32 %v648_v11, %v579_v26  ;;  %v447_v54 = vmul.f32 %v1424_v45, %v1555_v2  ;;  %1116 = vst.msk [vmem:[%s1656_s13 + $0x60] sm:$0xff] %vm1103_vm0, %v1083_v35  ;;  %v952_v52 = vmul.f32 %v1593_v15, %v1393_v47  ;;  %v1053_v48 = vmul.f32 %v1598_v16, %v1426_v38 }
  0x54   : > { %v983_v50 = vadd.f32 %v951_v20, %v882_v41  ;;  %v750_v56 = vmul.f32 %v1425_v29, %v1583_v13  ;;  %v580_v57 = vadd.f32 %v548_v36, %v478_v49  ;;  %v378_v60 = vadd.f32 %v346_v37, %v245_v43  ;;  %v1363_v41 = vld [vmem:[%s1560_s22 + $0xf8] sm:$0xff] }
  0x55   : > { %v781_v51 = vadd.f32 %v749_v25, %v680_v46  ;;  %v549_v62 = vmul.f32 %v1360_v31, %v1565_v3  ;;  %v852_v44 = vmul.f32 %v1588_v14, %v1361_v61  ;;  %v650_v45 = vmul.f32 %v1393_v47, %v1570_v4 }
  0x56   : > { %v1084_v58 = vadd.f32 %v1052_v39, %v983_v50  ;;  %v246_v53 = vmul.f32 %v1359_v17, %v1545_v0  ;;  %v681_v55 = vadd.f32 %v649_v42, %v580_v57  ;;  %v479_v7 = vadd.f32 %v447_v54, %v378_v60  ;;  %v1396_v42 = vld [vmem:[%s1560_s22 + $0xf9] sm:$0xff] }
  0x57   : > { %v883_v5 = vadd.f32 %v851_v34, %v781_v51  ;;  %v347_v63 = vmul.f32 %v1392_v18, %v1550_v1  ;;  %v953_v9 = vmul.f32 %v1593_v15, %v1394_v6  ;;  %v751_v10 = vmul.f32 %v1426_v38, %v1583_v13 }
  0x58   : > { %1117 = vst.msk [vmem:[%s1656_s13 + $0x68] sm:$0xff] %vm1103_vm0, %v1084_v58  ;;  %v448_v12 = vmul.f32 %v1425_v29, %v1555_v2  ;;  %v550_v19 = vmul.f32 %v1361_v61, %v1565_v3  ;;  %v782_v17 = vadd.f32 %v750_v56, %v681_v55  ;;  %v581_v21 = vadd.f32 %v549_v62, %v479_v7 }
  0x59   : > { %v984_v20 = vadd.f32 %v952_v52, %v883_v5  ;;  %v379_v24 = vadd.f32 %v347_v63, %v246_v53  ;;  %v1054_v18 = vmul.f32 %v1598_v16, %v1427_v23  ;;  %v853_v27 = vmul.f32 %v1588_v14, %v1362_v22  ;;  %v1429_v52 = vld [vmem:[%s1560_s22 + $0xfa] sm:$0xff] }
  0x5a   : > { %v651_v59 = vmul.f32 %v1394_v6, %v1570_v4  ;;  %v247_v8 = vmul.f32 %v1360_v31, %v1545_v0  ;;  %v884_v11 = vadd.f32 %v852_v44, %v782_v17  ;;  %v682_v28 = vadd.f32 %v650_v45, %v581_v21 }
  0x5b   : > { %v1085_v29 = vadd.f32 %v1053_v48, %v984_v20  ;;  %v480_v33 = vadd.f32 %v448_v12, %v379_v24  ;;  %v954_v39 = vmul.f32 %v1593_v15, %v1395_v30  ;;  %v1055_v25 = vmul.f32 %v1598_v16, %v1428_v32  ;;  %v1397_v12 = vld [vmem:[%s1560_s22 + $0x109] sm:$0xff] }
  0x5c   : > { %v348_v26 = vmul.f32 %v1393_v47, %v1550_v1  ;;  %v449_v34 = vmul.f32 %v1426_v38, %v1555_v2  ;;  %v985_v31 = vadd.f32 %v953_v9, %v884_v11  ;;  %v783_v40 = vadd.f32 %v751_v10, %v682_v28 }
  0x5d   : > { %1118 = vst.msk [vmem:[%s1656_s13 + $0x70] sm:$0xff] %vm1103_vm0, %v1085_v29  ;;  %v582_v36 = vadd.f32 %v550_v19, %v480_v33  ;;  %v752_v35 = vmul.f32 %v1427_v23, %v1583_v13  ;;  %v854_v43 = vmul.f32 %v1588_v14, %v1363_v41  ;;  %v955_v46 = vmul.f32 %v1593_v15, %v1396_v42  ;;  %v1430_v19 = vld [vmem:[%s1560_s22 + $0x10a] sm:$0xff] }
  0x5e   : > { %v380_v49 = vadd.f32 %v348_v26, %v247_v8  ;;  %v551_v47 = vmul.f32 %v1362_v22, %v1565_v3  ;;  %v1086_v38 = vadd.f32 %v1054_v18, %v985_v31  ;;  %v885_v37 = vadd.f32 %v853_v27, %v783_v40  ;;  %v1365_v8 = vld [vmem:[%s1560_s22 + $0x110] sm:$0xff] }
  0x5f   : > { %v683_v54 = vadd.f32 %v651_v59, %v582_v36  ;;  %v248_v50 = vmul.f32 %v1361_v61, %v1545_v0  ;;  %v652_v56 = vmul.f32 %v1395_v30, %v1570_v4  ;;  %v349_v51 = vmul.f32 %v1394_v6, %v1550_v1  ;;  %v1364_v61 = vld [vmem:[%s1560_s22 + $0x108] sm:$0xff]  ;;  %v1398_v26 = vld [vmem:[%s1560_s22 + $0x111] sm:$0xff] }
  0x60   : > { %v481_v48 = vadd.f32 %v449_v34, %v380_v49  ;;  %v450_v57 = vmul.f32 %v1427_v23, %v1555_v2  ;;  %1119 = vst.msk [vmem:[%s1656_s13 + $0x78] sm:$0xff] %vm1103_vm0, %v1086_v38  ;;  %v986_v60 = vadd.f32 %v954_v39, %v885_v37  ;;  %v1056_v58 = vmul.f32 %v1598_v16, %v1429_v52  ;;  %v1431_v49 = vld [vmem:[%s1560_s22 + $0x112] sm:$0xff]  ;;  %v1366_v38 = vld [vmem:[%s1560_s22 + $0x120] sm:$0xff] }
  0x61   : > { %v784_v62 = vadd.f32 %v752_v35, %v683_v54  ;;  %v753_v44 = vmul.f32 %v1428_v32, %v1583_v13  ;;  %v855_v53 = vmul.f32 %v1588_v14, %v1364_v61  ;;  %v381_v5 = vadd.f32 %v349_v51, %v248_v50 }
  0x62   : > { %v583_v45 = vadd.f32 %v551_v47, %v481_v48  ;;  %v552_v55 = vmul.f32 %v1363_v41, %v1565_v3  ;;  %v1087_v6 = vadd.f32 %v1055_v25, %v986_v60  ;;  %v653_v63 = vmul.f32 %v1396_v42, %v1570_v4  ;;  %v1432_v60 = vld [vmem:[%s1560_s22 + $0x122] sm:$0xff] }
  0x63   : > { %v886_v7 = vadd.f32 %v854_v43, %v784_v62  ;;  %v249_v9 = vmul.f32 %v1362_v22, %v1545_v0  ;;  %v482_v20 = vadd.f32 %v450_v57, %v381_v5  ;;  %v350_v17 = vmul.f32 %v1395_v30, %v1550_v1  ;;  %v1399_v57 = vld [vmem:[%s1560_s22 + $0x121] sm:$0xff] }
  0x64   : > { %v684_v10 = vadd.f32 %v652_v56, %v583_v45  ;;  %v451_v23 = vmul.f32 %v1428_v32, %v1555_v2  ;;  %1120 = vst.msk [vmem:[%s1656_s13 + $0x80] sm:$0xff] %vm1103_vm0, %v1087_v6  ;;  %v956_v24 = vmul.f32 %v1593_v15, %v1397_v12  ;;  %v1057_v18 = vmul.f32 %v1598_v16, %v1430_v19 }
  0x65   : > { %v987_v21 = vadd.f32 %v955_v46, %v886_v7  ;;  %v754_v27 = vmul.f32 %v1429_v52, %v1583_v13  ;;  %v584_v59 = vadd.f32 %v552_v55, %v482_v20  ;;  %v382_v29 = vadd.f32 %v350_v17, %v249_v9  ;;  %v1367_v7 = vld [vmem:[%s1560_s22 + $0x128] sm:$0xff] }
  0x66   : > { %v785_v22 = vadd.f32 %v753_v44, %v684_v10  ;;  %v553_v11 = vmul.f32 %v1364_v61, %v1565_v3  ;;  %v856_v30 = vmul.f32 %v1588_v14, %v1365_v8  ;;  %v654_v32 = vmul.f32 %v1397_v12, %v1570_v4 }
  0x67   : > { %v1088_v28 = vadd.f32 %v1056_v58, %v987_v21  ;;  %v250_v33 = vmul.f32 %v1363_v41, %v1545_v0  ;;  %v685_v25 = vadd.f32 %v653_v63, %v584_v59  ;;  %v483_v34 = vadd.f32 %v451_v23, %v382_v29  ;;  %v1400_v63 = vld [vmem:[%s1560_s22 + $0x129] sm:$0xff] }
  0x68   : > { %v887_v39 = vadd.f32 %v855_v53, %v785_v22  ;;  %v351_v31 = vmul.f32 %v1396_v42, %v1550_v1  ;;  %v957_v40 = vmul.f32 %v1593_v15, %v1398_v26  ;;  %v755_v36 = vmul.f32 %v1430_v19, %v1583_v13 }
  0x69   : > { %1121 = vst.msk [vmem:[%s1656_s13 + $0x88] sm:$0xff] %vm1103_vm0, %v1088_v28  ;;  %v452_v35 = vmul.f32 %v1429_v52, %v1555_v2  ;;  %v554_v43 = vmul.f32 %v1365_v8, %v1565_v3  ;;  %v786_v41 = vadd.f32 %v754_v27, %v685_v25  ;;  %v585_v47 = vadd.f32 %v553_v11, %v483_v34 }
  0x6a   : > { %v988_v46 = vadd.f32 %v956_v24, %v887_v39  ;;  %v383_v37 = vadd.f32 %v351_v31, %v250_v33  ;;  %v1058_v42 = vmul.f32 %v1598_v16, %v1431_v49  ;;  %v857_v54 = vmul.f32 %v1588_v14, %v1366_v38  ;;  %v1433_v24 = vld [vmem:[%s1560_s22 + $0x12a] sm:$0xff] }
  0x6b   : > { %v655_v50 = vmul.f32 %v1398_v26, %v1570_v4  ;;  %v251_v48 = vmul.f32 %v1364_v61, %v1545_v0  ;;  %v888_v56 = vadd.f32 %v856_v30, %v786_v41  ;;  %v686_v51 = vadd.f32 %v654_v32, %v585_v47 }
  0x6c   : > { %v1089_v52 = vadd.f32 %v1057_v18, %v988_v46  ;;  %v484_v62 = vadd.f32 %v452_v35, %v383_v37  ;;  %v958_v58 = vmul.f32 %v1593_v15, %v1399_v57  ;;  %v1059_v44 = vmul.f32 %v1598_v16, %v1432_v60  ;;  %v1401_v35 = vld [vmem:[%s1560_s22 + $0x139] sm:$0xff] }
  0x6d   : > { %v352_v45 = vmul.f32 %v1397_v12, %v1550_v1  ;;  %v453_v53 = vmul.f32 %v1430_v19, %v1555_v2  ;;  %v989_v61 = vadd.f32 %v957_v40, %v888_v56  ;;  %v787_v5 = vadd.f32 %v755_v36, %v686_v51 }
  0x6e   : > { %1122 = vst.msk [vmem:[%s1656_s13 + $0x90] sm:$0xff] %vm1103_vm0, %v1089_v52  ;;  %v586_v55 = vadd.f32 %v554_v43, %v484_v62  ;;  %v756_v6 = vmul.f32 %v1431_v49, %v1583_v13  ;;  %v858_v9 = vmul.f32 %v1588_v14, %v1367_v7  ;;  %v959_v10 = vmul.f32 %v1593_v15, %v1400_v63  ;;  %v1434_v43 = vld [vmem:[%s1560_s22 + $0x13a] sm:$0xff] }
  0x6f   : > { %v384_v20 = vadd.f32 %v352_v45, %v251_v48  ;;  %v555_v12 = vmul.f32 %v1366_v38, %v1565_v3  ;;  %v1090_v19 = vadd.f32 %v1058_v42, %v989_v61  ;;  %v889_v17 = vadd.f32 %v857_v54, %v787_v5  ;;  %v1959_v52 = vld [vmem:[%s2118_s1] ss:$0 sm:$0xff]  ;;  %v1966_v62 = vld [vmem:[%s2118_s1 + $0x1] ss:$0 sm:$0xff]  ;;  %v1975_v45 = vld [vmem:[%s2118_s1 + $0x5] ss:$0 sm:$0xff] }
  0x70   : > { %v687_v23 = vadd.f32 %v655_v50, %v586_v55  ;;  %v252_v21 = vmul.f32 %v1365_v8, %v1545_v0  ;;  %v656_v27 = vmul.f32 %v1399_v57, %v1570_v4  ;;  %v353_v22 = vmul.f32 %v1398_v26, %v1550_v1  ;;  %v1368_v8 = vld [vmem:[%s1560_s22 + $0x138] sm:$0xff]  ;;  %v1981_v61 = vld [vmem:[%s2118_s1 + $0x2] ss:$0 sm:$0xff] }
  0x71   : > { %v485_v18 = vadd.f32 %v453_v53, %v384_v20  ;;  %v454_v59 = vmul.f32 %v1431_v49, %v1555_v2  ;;  %1123 = vst.msk [vmem:[%s1656_s13 + $0x98] sm:$0xff] %vm1103_vm0, %v1090_v19  ;;  %v990_v29 = vadd.f32 %v958_v58, %v889_v17  ;;  %v1060_v28 = vmul.f32 %v1598_v16, %v1433_v24  ;;  %v1990_v20 = vld [vmem:[%s2118_s1 + $0x8] ss:$0 sm:$0xff]  ;;  %v1996_v19 = vld [vmem:[%s2118_s1 + $0x6] ss:$0 sm:$0xff] }
  0x72   : > { %v788_v11 = vadd.f32 %v756_v6, %v687_v23  ;;  %v757_v30 = vmul.f32 %v1432_v60, %v1583_v13  ;;  %v859_v33 = vmul.f32 %v1588_v14, %v1368_v8  ;;  %v385_v39 = vadd.f32 %v353_v22, %v252_v21  ;;  %v1403_v22 = vld [vmem:[%s1560_s22 + $0x151] sm:$0xff] }
  0x73   : > { %v587_v32 = vadd.f32 %v555_v12, %v485_v18  ;;  %v556_v25 = vmul.f32 %v1367_v7, %v1565_v3  ;;  %v1091_v26 = vadd.f32 %v1059_v44, %v990_v29  ;;  %v657_v31 = vmul.f32 %v1400_v63, %v1570_v4 }
  0x74   : > { %v890_v34 = vadd.f32 %v858_v9, %v788_v11  ;;  %v253_v40 = vmul.f32 %v1366_v38, %v1545_v0  ;;  %v486_v46 = vadd.f32 %v454_v59, %v385_v39  ;;  %v354_v41 = vmul.f32 %v1399_v57, %v1550_v1  ;;  %v1369_v38 = vld [vmem:[%s1560_s22 + $0x140] sm:$0xff]  ;;  %v1370_v9 = vld [vmem:[%s1560_s22 + $0x150] sm:$0xff] }
  0x75   : > { %v688_v36 = vadd.f32 %v656_v27, %v587_v32  ;;  %v455_v49 = vmul.f32 %v1432_v60, %v1555_v2  ;;  %1124 = vst.msk [vmem:[%s1656_s13 + $0xa0] sm:$0xff] %vm1103_vm0, %v1091_v26  ;;  %v960_v3 = vmul.f32 %v1593_v15, %v1401_v35  ;;  %v1061_v37 = vmul.f32 %v1598_v16, %v1434_v43  ;;  %v1946_v1 = vld [vmem:[%s2118_s1 + $0x3] ss:$0 sm:$0xff]  ;;  %v1953_v16 = vld [vmem:[%s2118_s1 + $0x4] ss:$0 sm:$0xff]  ;;  %v1436_v59 = vld [vmem:[%s1560_s22 + $0x152] sm:$0xff] }
  0x76   : > { %v991_v47 = vadd.f32 %v959_v10, %v890_v34  ;;  %v758_v4 = vmul.f32 %v1433_v24, %v1583_v13  ;;  %v588_v0 = vadd.f32 %v556_v25, %v486_v46  ;;  %v386_v54 = vadd.f32 %v354_v41, %v253_v40  ;;  %v1402_v60 = vld [vmem:[%s1560_s22 + $0x141] sm:$0xff]  ;;  %v1371_v34 = vld [vmem:[%s1560_s22 + $0x158] sm:$0xff] }
  0x77   : > { %v789_v42 = vadd.f32 %v757_v30, %v688_v36  ;;  %v557_v2 = vmul.f32 %v1946_v1, %v1368_v8  ;;  %v860_v48 = vmul.f32 %v1588_v14, %v1369_v38  ;;  %v658_v13 = vmul.f32 %v1953_v16, %v1401_v35  ;;  %v2006_v11 = vld [vmem:[%s2118_s1 + $0x7] ss:$0 sm:$0xff] }
  0x78   : > { %v1092_v50 = vadd.f32 %v1060_v28, %v991_v47  ;;  %v254_v56 = vmul.f32 %v1959_v52, %v1367_v7  ;;  %v689_v57 = vadd.f32 %v657_v31, %v588_v0  ;;  %v487_v14 = vadd.f32 %v455_v49, %v386_v54  ;;  %v1435_v7 = vld [vmem:[%s1560_s22 + $0x142] sm:$0xff]  ;;  %v1404_v31 = vld [vmem:[%s1560_s22 + $0x159] sm:$0xff] }
  0x79   : > { %v891_v51 = vadd.f32 %v859_v33, %v789_v42  ;;  %v355_v58 = vmul.f32 %v1966_v62, %v1400_v63  ;;  %v961_v44 = vmul.f32 %v1593_v15, %v1402_v60  ;;  %v759_v53 = vmul.f32 %v1975_v45, %v1434_v43 }
  0x7a   : > { %1125 = vst.msk [vmem:[%s1656_s13 + $0xa8] sm:$0xff] %vm1103_vm0, %v1092_v50  ;;  %v456_v5 = vmul.f32 %v1981_v61, %v1433_v24  ;;  %v558_v55 = vmul.f32 %v1946_v1, %v1369_v38  ;;  %v790_v15 = vadd.f32 %v758_v4, %v689_v57  ;;  %v589_v63 = vadd.f32 %v557_v2, %v487_v14 }
  0x7b   : > { %v992_v6 = vadd.f32 %v960_v3, %v891_v51  ;;  %v387_v10 = vadd.f32 %v355_v58, %v254_v56  ;;  %v1062_v12 = vmul.f32 %v1990_v20, %v1435_v7  ;;  %v861_v17 = vmul.f32 %v1996_v19, %v1370_v9  ;;  %v1437_v3 = vld [vmem:[%s1560_s22 + $0x15a] sm:$0xff] }
  0x7c   : > { %v659_v23 = vmul.f32 %v1953_v16, %v1402_v60  ;;  %v255_v21 = vmul.f32 %v1959_v52, %v1368_v8  ;;  %v892_v18 = vadd.f32 %v860_v48, %v790_v15  ;;  %v690_v27 = vadd.f32 %v658_v13, %v589_v63 }
  0x7d   : > { %v1093_v24 = vadd.f32 %v1061_v37, %v992_v6  ;;  %v488_v29 = vadd.f32 %v456_v5, %v387_v10  ;;  %v962_v28 = vmul.f32 %v2006_v11, %v1403_v22  ;;  %v1063_v30 = vmul.f32 %v1990_v20, %v1436_v59  ;;  %v1405_v5 = vld [vmem:[%s1560_s22 + $0x169] sm:$0xff] }
  0x7e   : > { %v356_v32 = vmul.f32 %v1966_v62, %v1401_v35  ;;  %v457_v8 = vmul.f32 %v1981_v61, %v1434_v43  ;;  %v993_v33 = vadd.f32 %v961_v44, %v892_v18  ;;  %v791_v39 = vadd.f32 %v759_v53, %v690_v27 }
  0x7f   : > { %1126 = vst.msk [vmem:[%s1656_s13 + $0xb0] sm:$0xff] %vm1103_vm0, %v1093_v24  ;;  %v590_v25 = vadd.f32 %v558_v55, %v488_v29  ;;  %v760_v26 = vmul.f32 %v1975_v45, %v1435_v7  ;;  %v862_v40 = vmul.f32 %v1996_v19, %v1371_v34  ;;  %v963_v36 = vmul.f32 %v2006_v11, %v1404_v31  ;;  %v1438_v55 = vld [vmem:[%s1560_s22 + $0x16a] sm:$0xff] }
  0x80   : > { %v388_v46 = vadd.f32 %v356_v32, %v255_v21  ;;  %v559_v35 = vmul.f32 %v1946_v1, %v1370_v9  ;;  %v1094_v43 = vadd.f32 %v1062_v12, %v993_v33  ;;  %v893_v41 = vadd.f32 %v861_v17, %v791_v39  ;;  %v1373_v21 = vld [vmem:[%s1560_s22 + $0x170] sm:$0xff] }
  0x81   : > { %v691_v49 = vadd.f32 %v659_v23, %v590_v25  ;;  %v256_v47 = vmul.f32 %v1959_v52, %v1369_v38  ;;  %v660_v4 = vmul.f32 %v1953_v16, %v1403_v22  ;;  %v357_v42 = vmul.f32 %v1966_v62, %v1402_v60  ;;  %v1372_v38 = vld [vmem:[%s1560_s22 + $0x168] sm:$0xff]  ;;  %v1406_v32 = vld [vmem:[%s1560_s22 + $0x171] sm:$0xff] }
  0x82   : > { %v489_v37 = vadd.f32 %v457_v8, %v388_v46  ;;  %v458_v0 = vmul.f32 %v1981_v61, %v1435_v7  ;;  %1127 = vst.msk [vmem:[%s1656_s13 + $0xb8] sm:$0xff] %vm1103_vm0, %v1094_v43  ;;  %v994_v54 = vadd.f32 %v962_v28, %v893_v41  ;;  %v1064_v50 = vmul.f32 %v1990_v20, %v1437_v3  ;;  %v1374_v43 = vld [vmem:[%s1560_s22 + $0x180] sm:$0xff] }
  0x83   : > { %v792_v2 = vadd.f32 %v760_v26, %v691_v49  ;;  %v761_v48 = vmul.f32 %v1975_v45, %v1436_v59  ;;  %v863_v56 = vmul.f32 %v1996_v19, %v1372_v38  ;;  %v389_v51 = vadd.f32 %v357_v42, %v256_v47 }
  0x84   : > { %v591_v13 = vadd.f32 %v559_v35, %v489_v37  ;;  %v560_v57 = vmul.f32 %v1946_v1, %v1371_v34  ;;  %v1095_v60 = vadd.f32 %v1063_v30, %v994_v54  ;;  %v661_v58 = vmul.f32 %v1953_v16, %v1404_v31 }
  0x85   : > { %v894_v14 = vadd.f32 %v862_v40, %v792_v2  ;;  %v257_v44 = vmul.f32 %v1959_v52, %v1370_v9  ;;  %v490_v6 = vadd.f32 %v458_v0, %v389_v51  ;;  %v358_v15 = vmul.f32 %v1966_v62, %v1403_v22  ;;  %v1407_v0 = vld [vmem:[%s1560_s22 + $0x181] sm:$0xff] }
  0x86   : > { %v692_v53 = vadd.f32 %v660_v4, %v591_v13  ;;  %v459_v7 = vmul.f32 %v1981_v61, %v1436_v59  ;;  %1128 = vst.msk [vmem:[%s1656_s13 + $0xc0] sm:$0xff] %vm1103_vm0, %v1095_v60  ;;  %v964_v10 = vmul.f32 %v2006_v11, %v1405_v5  ;;  %v1065_v12 = vmul.f32 %v1990_v20, %v1438_v55  ;;  %v1440_v51 = vld [vmem:[%s1560_s22 + $0x182] sm:$0xff] }
  0x87   : > { %v995_v63 = vadd.f32 %v963_v36, %v894_v14  ;;  %v762_v17 = vmul.f32 %v1975_v45, %v1437_v3  ;;  %v592_v23 = vadd.f32 %v560_v57, %v490_v6  ;;  %v390_v24 = vadd.f32 %v358_v15, %v257_v44  ;;  %v1375_v60 = vld [vmem:[%s1560_s22 + $0x188] sm:$0xff] }
  0x88   : > { %v793_v9 = vadd.f32 %v761_v48, %v692_v53  ;;  %v561_v18 = vmul.f32 %v1946_v1, %v1372_v38  ;;  %v864_v22 = vmul.f32 %v1996_v19, %v1373_v21  ;;  %v662_v59 = vmul.f32 %v1953_v16, %v1405_v5 }
  0x89   : > { %v1096_v27 = vadd.f32 %v1064_v50, %v995_v63  ;;  %v258_v29 = vmul.f32 %v1959_v52, %v1371_v34  ;;  %v693_v30 = vadd.f32 %v661_v58, %v592_v23  ;;  %v491_v8 = vadd.f32 %v459_v7, %v390_v24  ;;  %v1439_v34 = vld [vmem:[%s1560_s22 + $0x172] sm:$0xff]  ;;  %v1408_v7 = vld [vmem:[%s1560_s22 + $0x189] sm:$0xff] }
  0x8a   : > { %v895_v28 = vadd.f32 %v863_v56, %v793_v9  ;;  %v359_v33 = vmul.f32 %v1966_v62, %v1404_v31  ;;  %v965_v39 = vmul.f32 %v2006_v11, %v1406_v32  ;;  %v763_v25 = vmul.f32 %v1975_v45, %v1438_v55 }
  0x8b   : > { %1129 = vst.msk [vmem:[%s1656_s13 + $0xc8] sm:$0xff] %vm1103_vm0, %v1096_v27  ;;  %v460_v26 = vmul.f32 %v1981_v61, %v1437_v3  ;;  %v562_v40 = vmul.f32 %v1946_v1, %v1373_v21  ;;  %v794_v46 = vadd.f32 %v762_v17, %v693_v30  ;;  %v593_v35 = vadd.f32 %v561_v18, %v491_v8  ;;  %v1376_v18 = vld [vmem:[%s1560_s22 + $0x198] sm:$0xff]  ;;  %v1441_v27 = vld [vmem:[%s1560_s22 + $0x18a] sm:$0xff] }
  0x8c   : > { %v996_v36 = vadd.f32 %v964_v10, %v895_v28  ;;  %v391_v41 = vadd.f32 %v359_v33, %v258_v29  ;;  %v1066_v31 = vmul.f32 %v1990_v20, %v1439_v34  ;;  %v865_v49 = vmul.f32 %v1996_v19, %v1374_v43  ;;  %v1409_v28 = vld [vmem:[%s1560_s22 + $0x199] sm:$0xff] }
  0x8d   : > { %v663_v47 = vmul.f32 %v1953_v16, %v1406_v32  ;;  %v259_v37 = vmul.f32 %v1959_v52, %v1372_v38  ;;  %v896_v4 = vadd.f32 %v864_v22, %v794_v46  ;;  %v694_v42 = vadd.f32 %v662_v59, %v593_v35  ;;  %v1410_v35 = vld [vmem:[%s1560_s22 + $0x1a1] sm:$0xff] }
  0x8e   : > { %v1097_v3 = vadd.f32 %v1065_v12, %v996_v36  ;;  %v492_v54 = vadd.f32 %v460_v26, %v391_v41  ;;  %v966_v2 = vmul.f32 %v2006_v11, %v1407_v0  ;;  %v360_v50 = vmul.f32 %v1966_v62, %v1405_v5  ;;  %v1377_v26 = vld [vmem:[%s1560_s22 + $0x1a0] sm:$0xff] }
  0x8f   : > { %v461_v48 = vmul.f32 %v1981_v61, %v1438_v55  ;;  %v997_v13 = vadd.f32 %v965_v39, %v896_v4  ;;  %v795_v56 = vadd.f32 %v763_v25, %v694_v42  ;;  %v764_v38 = vmul.f32 %v1975_v45, %v1439_v34  ;;  %v1442_v25 = vld [vmem:[%s1560_s22 + $0x19a] sm:$0xff] }
  0x90   : > { %1130 = vst.msk [vmem:[%s1656_s13 + $0xd0] sm:$0xff] %vm1103_vm0, %v1097_v3  ;;  %v594_v57 = vadd.f32 %v562_v40, %v492_v54  ;;  %v1067_v14 = vmul.f32 %v1990_v20, %v1440_v51  ;;  %v866_v58 = vmul.f32 %v1996_v19, %v1375_v60  ;;  %v392_v44 = vadd.f32 %v360_v50, %v259_v37 }
  0x91   : > { %v563_v53 = vmul.f32 %v1946_v1, %v1374_v43  ;;  %v1098_v5 = vadd.f32 %v1066_v31, %v997_v13  ;;  %v897_v55 = vadd.f32 %v865_v49, %v795_v56  ;;  %v260_v15 = vmul.f32 %v1959_v52, %v1373_v21  ;;  %v1443_v49 = vld [vmem:[%s1560_s22 + $0x1a2] sm:$0xff] }
  0x92   : > { %v695_v6 = vadd.f32 %v663_v47, %v594_v57  ;;  %v493_v63 = vadd.f32 %v461_v48, %v392_v44  ;;  %v664_v10 = vmul.f32 %v1953_v16, %v1407_v0  ;;  %v361_v12 = vmul.f32 %v1966_v62, %v1406_v32 }
  0x93   : > { %v462_v17 = vmul.f32 %v1981_v61, %v1439_v34  ;;  %1131 = vst.msk [vmem:[%s1656_s13 + $0xd8] sm:$0xff] %vm1103_vm0, %v1098_v5  ;;  %v998_v9 = vadd.f32 %v966_v2, %v897_v55  ;;  %v967_v24 = vmul.f32 %v2006_v11, %v1408_v7  ;;  %v765_v21 = vmul.f32 %v1975_v45, %v1440_v51 }
  0x94   : > { %v796_v23 = vadd.f32 %v764_v38, %v695_v6  ;;  %v595_v52 = vadd.f32 %v563_v53, %v493_v63  ;;  %v393_v22 = vadd.f32 %v361_v12, %v260_v15  ;;  %v564_v59 = vmul.f32 %v1946_v1, %v1375_v60 }
  0x95   : > { %v1099_v62 = vadd.f32 %v1067_v14, %v998_v9  ;;  %v1068_v61 = vmul.f32 %v1990_v20, %v1441_v27  ;;  %v867_v32 = vmul.f32 %v1996_v19, %v1376_v18  ;;  %v665_v33 = vmul.f32 %v1953_v16, %v1408_v7 }
  0x96   : > { %v898_v29 = vadd.f32 %v866_v58, %v796_v23  ;;  %v696_v30 = vadd.f32 %v664_v10, %v595_v52  ;;  %v494_v8 = vadd.f32 %v462_v17, %v393_v22  ;;  %v968_v40 = vmul.f32 %v2006_v11, %v1409_v28 }
  0x97   : > { %1132 = vst.msk [vmem:[%s1656_s13 + $0xe0] sm:$0xff] %vm1103_vm0, %v1099_v62  ;;  %v766_v46 = vmul.f32 %v1975_v45, %v1441_v27  ;;  %v1069_v41 = vmul.f32 %v1990_v20, %v1442_v25  ;;  %v868_v31 = vmul.f32 %v1996_v19, %v1377_v26  ;;  %v969_v3 = vmul.f32 %v2006_v11, %v1410_v35 }
  0x98   : > { %v999_v39 = vadd.f32 %v967_v24, %v898_v29  ;;  %v797_v1 = vadd.f32 %v765_v21, %v696_v30  ;;  %v596_v36 = vadd.f32 %v564_v59, %v494_v8  ;;  %v1070_v45 = vmul.f32 %v1990_v20, %v1443_v49 }
  0x9a   : > { %v1100_v34 = vadd.f32 %v1068_v61, %v999_v39  ;;  %v899_v43 = vadd.f32 %v867_v32, %v797_v1  ;;  %v697_v16 = vadd.f32 %v665_v33, %v596_v36 }
  0x9c   : > { %1133 = vst.msk [vmem:[%s1656_s13 + $0xe8] sm:$0xff] %vm1103_vm0, %v1100_v34  ;;  %v1000_v47 = vadd.f32 %v968_v40, %v899_v43  ;;  %v798_v37 = vadd.f32 %v766_v46, %v697_v16 }
  0x9e   : > { %v1101_v4 = vadd.f32 %v1069_v41, %v1000_v47  ;;  %v900_v42 = vadd.f32 %v868_v31, %v798_v37 }
  0xa0   : > { %1134 = vst.msk [vmem:[%s1656_s13 + $0xf0] sm:$0xff] %vm1103_vm0, %v1101_v4  ;;  %v1001_v0 = vadd.f32 %v969_v3, %v900_v42 }
  0xa2   : > { %v1102_v54 = vadd.f32 %v1070_v45, %v1001_v0 }
  0xa4   : > { %1135 = vst.msk [vmem:[%s1656_s13 + $0xf8] sm:$0xff] %vm1103_vm0, %v1102_v54 }
  0xa5 PF: > { %s12_s11 = sadd.s32 1, %s1504_s11   ;;  %s2120_s9 = smov %s1500_s10 }
  0xa6   : > { %p9_p5 = scmp.ge.s32.totalorder %s12_s11, 4   ;;  %s2121_s10 = smov %s2123_s12 }
  0xa8   :  { %11 = sbr.rel (!%p9_p5) target bundleno = 2 (0x2), region = 63 }

</bundles_post_ra>
